<compile_context>
chip_gen: v7x
topology: tpu7x:2x2x1
jax: 0.10.0
libtpu: 0.0.40
codegen_flags: <defaults>
</compile_context>

<pallas_src>
import jax
import jax.numpy as jnp
from jax.experimental import pallas as pl
from jax.experimental.pallas import tpu as pltpu

_LANE = 128
_TB_CAP = 4096          # max batch rows (lanes) handled per grid step

# ---------------------------------------------------------------------------
# Packed parameter blob (bf16, shape (400, 128)); all row offsets are multiples
# of 16 so static slices stay aligned to bf16 sublane packing:
#   rows   0:128 -> W2^T  (64, 32) zero-padded to (128, 128)
#   rows 128:256 -> W3^T (128, 64) zero-padded to (128, 128)
#   rows 256:272 -> W4^T (  2,128) zero-padded to ( 16, 128)
#   rows 272:400 -> bias columns: col0=b1, col1=b2, col2=b3, col3=b4 (padded)
# ---------------------------------------------------------------------------
_W2, _W3, _W4, _BIAS = 0, 128, 256, 272
_BLOB_ROWS = 400


def mlp_kernel(x_ref, w1_ref, p_ref, out_ref):
    xT = x_ref[...]                                    # (16, TB) bf16; rows 4:16 zero
    w1t = w1_ref[...]                                  # (128, 16) bf16
    w2t = p_ref[_W2:_W3, :]                            # (128, 128) bf16
    w3t = p_ref[_W3:_W4, :]                            # (128, 128) bf16
    w4t = p_ref[_W4:_BIAS, :]                          # (16, 128)  bf16
    bias = p_ref[_BIAS:_BIAS + 128, :].astype(jnp.float32)   # (128, 128) f32

    # fc1 + ReLU  (rows 32:128 stay exactly 0 thanks to zero padding)
    h = jnp.dot(w1t, xT, preferred_element_type=jnp.float32)      # (128, TB) f32
    h = jnp.maximum(h + bias[:, 0:1], 0.0).astype(jnp.bfloat16)
    # fc2 + ReLU  (rows 64:128 stay exactly 0)
    h = jnp.dot(w2t, h, preferred_element_type=jnp.float32)
    h = jnp.maximum(h + bias[:, 1:2], 0.0).astype(jnp.bfloat16)
    # fc3 + ReLU
    h = jnp.dot(w3t, h, preferred_element_type=jnp.float32)
    h = jnp.maximum(h + bias[:, 2:3], 0.0).astype(jnp.bfloat16)
    # fc4 (no activation); rows 2:16 stay exactly 0
    y = jnp.dot(w4t, h, preferred_element_type=jnp.float32)       # (16, TB) f32
    y = y + bias[:16, 3:4]

    out_ref[...] = y[:8, :].astype(out_ref.dtype)                 # lane-dense (8, TB)


def _round_up(n, m):
    return ((n + m - 1) // m) * m


def _tiles(batch):
    """Return (padded batch, lane-tile size, num grid steps)."""
    if batch <= _LANE:
        return _LANE, _LANE, 1
    bp = _round_up(batch, 2 * _LANE)                        # at least two lane tiles
    tb = min(_TB_CAP, max(_LANE, (bp // 2) // _LANE * _LANE))  # nb >= 2 -> both v7x TCs
    bp = _round_up(bp, tb)
    return bp, tb, bp // tb


def pack_params(params):
    """Pack parameters into (w1t, blob):
       w1t:  (128, 16) bf16  -- W1^T zero-padded (separate so layer-1's K is 16,
                                matching the 16-row x tile)
       blob: (400, 128) bf16 -- W2^T, W3^T, W4^T and the four bias columns.
    """
    f32 = jnp.float32

    def pad_t(w, rows, cols):
        wt = jnp.asarray(w, f32).T
        return jnp.zeros((rows, cols), f32).at[: wt.shape[0], : wt.shape[1]].set(wt)

    w1t = pad_t(params["w1"], 128, 16)
    w2t = pad_t(params["w2"], 128, 128)
    w3t = pad_t(params["w3"], 128, 128)
    w4t = pad_t(params["w4"], 16, 128)

    bias = jnp.zeros((128, 128), f32)
    for col, name in enumerate(("b1", "b2", "b3", "b4")):
        b = jnp.asarray(params[name], f32).reshape(-1)
        bias = bias.at[: b.shape[0], col].set(b)

    blob = jnp.concatenate([w2t, w3t, w4t, bias], axis=0).astype(jnp.bfloat16)
    assert blob.shape == (_BLOB_ROWS, 128)
    return w1t.astype(jnp.bfloat16), blob


def network_forward(x, w1t, blob):
    """x: (B, 4) float; w1t/blob from pack_params(). Returns (B, 2) f32 q-values.

    Note: for single-observation action selection (B == 1) in the RL loop this
    kernel is pure launch overhead -- batch requests or use plain XLA there.
    """
    B = x.shape[0]
    Bp, TB, nb = _tiles(B)

    # Batch along lanes: features on sublanes (rows 0:4), zero-padded to 16 rows.
    xT = jnp.zeros((16, Bp), jnp.bfloat16).at[:4, :B].set(x.T.astype(jnp.bfloat16))

    out = pl.pallas_call(
        mlp_kernel,
        out_shape=jax.ShapeDtypeStruct((8, Bp), jnp.float32),
        grid=(nb,),
        in_specs=[
            pl.BlockSpec((16, TB), lambda i: (0, i)),            # x tile, streamed
            pl.BlockSpec((128, 16), lambda i: (0, 0)),           # W1^T, resident
            pl.BlockSpec((_BLOB_ROWS, 128), lambda i: (0, 0)),   # blob, resident
        ],
        out_specs=pl.BlockSpec((8, TB), lambda i: (0, i)),
        compiler_params=pltpu.CompilerParams(
            dimension_semantics=("parallel",),
            vmem_limit_bytes=32 * 1024 * 1024),
    )(xT, w1t, blob)

    return out[:2, :B].T                                          # (B, 2)


def init_params(key):
    """Deterministic init mimicking PyTorch nn.Linear default:
    U(-1/sqrt(fan_in), 1/sqrt(fan_in)) for both weight and bias."""
    dims = [(4, 32), (32, 64), (64, 128), (128, 2)]
    params = {}
    keys = jax.random.split(key, 2 * len(dims))
    for i, (fan_in, fan_out) in enumerate(dims):
        bound = 1.0 / jnp.sqrt(jnp.float32(fan_in))
        params[f"w{i + 1}"] = jax.random.uniform(
            keys[2 * i], (fan_in, fan_out), minval=-bound, maxval=bound,
            dtype=jnp.float32)
        params[f"b{i + 1}"] = jax.random.uniform(
            keys[2 * i + 1], (1, fan_out), minval=-bound, maxval=bound,
            dtype=jnp.float32)
    return params


def reference_forward(x, params):
    h = jnp.maximum(x @ params["w1"] + params["b1"], 0.0)
    h = jnp.maximum(h @ params["w2"] + params["b2"], 0.0)
    h = jnp.maximum(h @ params["w3"] + params["b3"], 0.0)
    return h @ params["w4"] + params["b4"]


if __name__ == "__main__":
    key = jax.random.PRNGKey(0)
    pkey, xkey = jax.random.split(key)
    params = init_params(pkey)
    w1t, blob = pack_params(params)

    # Exercise both the single-step (B <= 128) and multi-step (nb >= 2) paths.
    for batch in (8, 384):
        xkey, sub = jax.random.split(xkey)
        x = jax.random.normal(sub, (batch, 4), dtype=jnp.float32)

        out = jax.block_until_ready(network_forward(x, w1t, blob))
        ref = reference_forward(x, params)

        assert out.shape == (batch, 2), out.shape
        max_err = float(jnp.max(jnp.abs(out - ref)))
        # bf16 params/activations with f32 accumulation: tolerance relaxed vs f32 ref.
        assert jnp.allclose(out, ref, atol=3e-2, rtol=3e-2), (
            "mismatch vs reference", max_err)

    print("KERNEL_OK")
</pallas_src>

<mosaic_0001>
module attributes {stable_mosaic.version = 11 : i64} {
  func.func @mlp_kernel(%arg0: i32, %arg1: memref<16x128xbf16, #tpu.memory_space<vmem>>, %arg2: memref<128x16xbf16, #tpu.memory_space<vmem>>, %arg3: memref<400x128xbf16, #tpu.memory_space<vmem>>, %arg4: memref<8x128xf32, #tpu.memory_space<vmem>>) attributes {dimension_semantics = [#tpu.dimension_semantics<parallel>], iteration_bounds = array<i64: 1>, scalar_prefetch = 0 : i64, scratch_operands = 0 : i64, tpu.core_type = #tpu.core_type<tc>, window_params = [{transform_indices = @transform_0, window_bounds = array<i64: 16, 128>}, {pipeline_mode = #tpu.pipeline_mode<synchronous>, transform_indices = @transform_1, window_bounds = array<i64: 128, 16>}, {pipeline_mode = #tpu.pipeline_mode<synchronous>, transform_indices = @transform_2, window_bounds = array<i64: 400, 128>}, {transform_indices = @transform_3, window_bounds = array<i64: 8, 128>}]} {
    %c0 = arith.constant 0 : index
    %c0_0 = arith.constant 0 : index
    %0 = vector.load %arg1[%c0, %c0_0] : memref<16x128xbf16, #tpu.memory_space<vmem>>, vector<16x128xbf16>
    %c0_1 = arith.constant 0 : index
    %c0_2 = arith.constant 0 : index
    %1 = vector.load %arg2[%c0_1, %c0_2] : memref<128x16xbf16, #tpu.memory_space<vmem>>, vector<128x16xbf16>
    %c0_3 = arith.constant 0 : index
    %c0_4 = arith.constant 0 : index
    %2 = vector.load %arg3[%c0_3, %c0_4] : memref<400x128xbf16, #tpu.memory_space<vmem>>, vector<128x128xbf16>
    %c128 = arith.constant 128 : index
    %c0_5 = arith.constant 0 : index
    %3 = vector.load %arg3[%c128, %c0_5] : memref<400x128xbf16, #tpu.memory_space<vmem>>, vector<128x128xbf16>
    %c256 = arith.constant 256 : index
    %c0_6 = arith.constant 0 : index
    %4 = vector.load %arg3[%c256, %c0_6] : memref<400x128xbf16, #tpu.memory_space<vmem>>, vector<16x128xbf16>
    %c272 = arith.constant 272 : index
    %c0_7 = arith.constant 0 : index
    %5 = vector.load %arg3[%c272, %c0_7] : memref<400x128xbf16, #tpu.memory_space<vmem>>, vector<128x128xbf16>
    %6 = arith.extf %5 : vector<128x128xbf16> to vector<128x128xf32>
    %cst = arith.constant dense<0.000000e+00> : vector<128x128xf32>
    %7 = tpu.matmul %1, %0, %cst {dimension_numbers = #tpu.dot_dimension_numbers<[1], [0], [0], [1], [0, 0, 1, 1], [], []>} : vector<128x16xbf16>, vector<16x128xbf16>, vector<128x128xf32> -> vector<128x128xf32>
    %8 = vector.extract_strided_slice %6 {offsets = [0, 0], sizes = [128, 1], strides = [1, 1]} : vector<128x128xf32> to vector<128x1xf32>
    %9 = vector.broadcast %8 : vector<128x1xf32> to vector<128x128xf32>
    %10 = arith.addf %7, %9 : vector<128x128xf32>
    %cst_8 = arith.constant 0.000000e+00 : f32
    %11 = vector.broadcast %cst_8 : f32 to vector<128x128xf32>
    %12 = arith.maximumf %10, %11 : vector<128x128xf32>
    %13 = arith.truncf %12 : vector<128x128xf32> to vector<128x128xbf16>
    %cst_9 = arith.constant dense<0.000000e+00> : vector<128x128xf32>
    %14 = tpu.matmul %2, %13, %cst_9 {dimension_numbers = #tpu.dot_dimension_numbers<[1], [0], [0], [1], [0, 0, 1, 1], [], []>} : vector<128x128xbf16>, vector<128x128xbf16>, vector<128x128xf32> -> vector<128x128xf32>
    %15 = vector.extract_strided_slice %6 {offsets = [0, 1], sizes = [128, 1], strides = [1, 1]} : vector<128x128xf32> to vector<128x1xf32>
    %16 = vector.broadcast %15 : vector<128x1xf32> to vector<128x128xf32>
    %17 = arith.addf %14, %16 : vector<128x128xf32>
    %cst_10 = arith.constant 0.000000e+00 : f32
    %18 = vector.broadcast %cst_10 : f32 to vector<128x128xf32>
    %19 = arith.maximumf %17, %18 : vector<128x128xf32>
    %20 = arith.truncf %19 : vector<128x128xf32> to vector<128x128xbf16>
    %cst_11 = arith.constant dense<0.000000e+00> : vector<128x128xf32>
    %21 = tpu.matmul %3, %20, %cst_11 {dimension_numbers = #tpu.dot_dimension_numbers<[1], [0], [0], [1], [0, 0, 1, 1], [], []>} : vector<128x128xbf16>, vector<128x128xbf16>, vector<128x128xf32> -> vector<128x128xf32>
    %22 = vector.extract_strided_slice %6 {offsets = [0, 2], sizes = [128, 1], strides = [1, 1]} : vector<128x128xf32> to vector<128x1xf32>
    %23 = vector.broadcast %22 : vector<128x1xf32> to vector<128x128xf32>
    %24 = arith.addf %21, %23 : vector<128x128xf32>
    %cst_12 = arith.constant 0.000000e+00 : f32
    %25 = vector.broadcast %cst_12 : f32 to vector<128x128xf32>
    %26 = arith.maximumf %24, %25 : vector<128x128xf32>
    %27 = arith.truncf %26 : vector<128x128xf32> to vector<128x128xbf16>
    %cst_13 = arith.constant dense<0.000000e+00> : vector<16x128xf32>
    %28 = tpu.matmul %4, %27, %cst_13 {dimension_numbers = #tpu.dot_dimension_numbers<[1], [0], [0], [1], [0, 0, 1, 1], [], []>} : vector<16x128xbf16>, vector<128x128xbf16>, vector<16x128xf32> -> vector<16x128xf32>
    %29 = vector.extract_strided_slice %6 {offsets = [0, 3], sizes = [16, 1], strides = [1, 1]} : vector<128x128xf32> to vector<16x1xf32>
    %30 = vector.broadcast %29 : vector<16x1xf32> to vector<16x128xf32>
    %31 = arith.addf %28, %30 : vector<16x128xf32>
    %32 = vector.extract_strided_slice %31 {offsets = [0, 0], sizes = [8, 128], strides = [1, 1]} : vector<16x128xf32> to vector<8x128xf32>
    %c0_14 = arith.constant 0 : index
    %c0_15 = arith.constant 0 : index
    %33 = vector.load %arg4[%c0_14, %c0_15] : memref<8x128xf32, #tpu.memory_space<vmem>>, vector<8x128xf32>
    tpu.vector_store %arg4[%c0_14, %c0_15], %32 {strides = array<i32>} : memref<8x128xf32, #tpu.memory_space<vmem>>, vector<8x128xf32>,
    return
  }
  func.func @transform_0(%arg0: i32) -> (i32, i32) {
    %c0_i32 = arith.constant 0 : i32
    %c0_i32_0 = arith.constant 0 : i32
    return %c0_i32, %arg0 : i32, i32
  }
  func.func @transform_1(%arg0: i32) -> (i32, i32) {
    %c0_i32 = arith.constant 0 : i32
    %c0_i32_0 = arith.constant 0 : i32
    %c0_i32_1 = arith.constant 0 : i32
    return %c0_i32, %c0_i32_0 : i32, i32
  }
  func.func @transform_2(%arg0: i32) -> (i32, i32) {
    %c0_i32 = arith.constant 0 : i32
    %c0_i32_0 = arith.constant 0 : i32
    %c0_i32_1 = arith.constant 0 : i32
    return %c0_i32, %c0_i32_0 : i32, i32
  }
  func.func @transform_3(%arg0: i32) -> (i32, i32) {
    %c0_i32 = arith.constant 0 : i32
    %c0_i32_0 = arith.constant 0 : i32
    return %c0_i32, %arg0 : i32, i32
  }
}

</mosaic_0001>

<bundles_post_ra>
// kernel: tpu_custom_call.1
= control target key start
LH: loop header
LB: loop body
LE: loop exit
PB: predicated region body
PF: predicated region fallthrough
CT: control target
= control target key end

     0   :  { %8 = vsyncpa [#allocation3], 0  ;;  %s1552_s0 = inlined_call_operand.vmem [shape: bf16[16,128], index: 0, kind: input, shape index: {}]   ;;  %s1553_s1 = inlined_call_operand.vmem [shape: bf16[128,16], index: 1, kind: input, shape index: {}]   ;;  %s1554_s2 = inlined_call_operand.hbm [shape: bf16[400,128], index: 2, kind: input, shape index: {}]   ;;  %s1555_s3 = inlined_call_operand.hbm [shape: f32[8,128], index: 3, kind: output, shape index: {}]  }
   0x1   :  { %9 = vsyncpa [#allocation4], 0  ;;  %s1406_s12 = smov [#allocation2]   ;;  %s1358_s16 = scalar_lea.hbm %s1554_s2, 3200 }
   0x2   :  { %s19_s13 = sshll.u32 %s1406_s12, 4  ;;  %p1359_p0 = scmp.ne.s32.totalorder %s1554_s2, %s1358_s16  ;;  %s20_s13 = int_to_ptr.vmem [resolvable:$true] %s19_s13 }
   0x3   :  { %p1362_p1 = scmp.lt.u32.totalorder %s1358_s16, %s1554_s2 }
   0x5   :  { %p1364_p2 = pnand %p1362_p1, %p1359_p0 }
   0x7   :  { %1367 = shalt.err (!%p1364_p2)
}
   0x8   :  { %s1368_s21 = scalar_lea.vmem %s20_s13, 3200  ;;  %p1373_p4 = scmp.lt.s32.totalorder %s20_s13, %s20_s13 }
   0x9   :  { %p1369_p3 = scmp.ne.s32.totalorder %s20_s13, %s1368_s21  ;;  %p1374_p5 = scmp.lt.s32.totalorder %s1368_s21, %s1368_s21 }
   0xb   :  { %p1375_p6 = por %p1374_p5, %p1373_p4 }
   0xd   :  { %p1376_p7 = pnand %p1375_p6, %p1369_p3 }
   0xf   :  { %1379 = shalt.err (!%p1376_p7)
}
  0x10   :  { %s1407_s22 = smov 64   ;;  %s1408_s23 = smov 4  }
  0x11   :  { %25 = dma.hbm_to_vmem [thread:$0]  %s1554_s2, 3200, %s20_s13, [#allocation3], %s1407_s22, %s1407_s22, %s1408_s23  }
  0x12   :  { %1402 = dma.done.wait [#allocation3], 3200  }
  0x13   :  { %1403 = vsyncadd [#allocation3], 4294964096  ;;  %v1409_v0 = vmov 0   ;;  %v1284_v1 = vld [vmem:[%s1552_s0] sm:$0xff]   ;;  %vm240_vm0 = vcmask 130048   ;;  %v1286_v3 = vld [vmem:[%s1553_s1 + $0x8] sm:$0xff]  }
  0x14   :  { %1157 = vset.pattern.permute.xlu0 %v1409_v0  ;;  %1168 = vset.pattern.permute.xlu1 %v1409_v0  ;;  %v1285_v2 = vld [vmem:[%s1553_s1] sm:$0xff]   ;;  %v1287_v4 = vld [vmem:[%s1553_s1 + $0x10] sm:$0xff]   ;;  %v1463_v5 = vld [vmem:[#allocation2 + $0x88] sm:$0xff]   ;;  %v1410_v43 = vmov 1   ;;  %vm1413_vm1 = vmmov 0  }
  0x15   :  { %1045 = vmatprep.subr.bf16.mxu0 %v1284_v1  ;;  %1047 = vmatprep.mubr.msk.bf16.mxu0 %vm240_vm0, %v1285_v2  ;;  %v988_v6 = vld [vmem:[#allocation2 + $0x90] sm:$0xff]   ;;  %v989_v7 = vld [vmem:[#allocation2 + $0x98] sm:$0xff]   ;;  %v1289_v9 = vld [vmem:[%s1553_s1 + $0x20] sm:$0xff]   ;;  %v957_v10 = vunpack.c.l.bf16 %v1463_v5  ;;  %v958_v11 = vunpack.c.h.bf16 %v1463_v5 }
  0x16   :  { %1046 = vmatpush3.bf16.msra.mxu0 %v1284_v1  ;;  %v1288_v8 = vld [vmem:[%s1553_s1 + $0x18] sm:$0xff]   ;;  %v961_v12 = vunpack.c.l.bf16 %v988_v6  ;;  %v962_v13 = vunpack.c.h.bf16 %v988_v6  ;;  %v990_v14 = vld [vmem:[#allocation2 + $0xa0] sm:$0xff]   ;;  %v965_v15 = vunpack.c.l.bf16 %v989_v7  ;;  %v966_v16 = vunpack.c.h.bf16 %v989_v7  ;;  %v991_v17 = vld [vmem:[#allocation2 + $0xa8] sm:$0xff]  }
  0x17   :  { %v992_v18 = vld [vmem:[#allocation2 + $0xb0] sm:$0xff]   ;;  %v1475_v19 = vpack.i.bf16 %v958_v11, %v957_v10  ;;  %v969_v20 = vunpack.c.l.bf16 %v990_v14  ;;  %v970_v21 = vunpack.c.h.bf16 %v990_v14  ;;  %v993_v23 = vld [vmem:[#allocation2 + $0xb8] sm:$0xff]   ;;  %v973_v25 = vunpack.c.l.bf16 %v991_v17  ;;  %v994_v27 = vld [vmem:[#allocation2 + $0xc0] sm:$0xff]  }
  0x18   :  { %v1477_v22 = vpack.i.bf16 %v966_v16, %v965_v15  ;;  %v1481_v24 = vpack.i.bf16 %v962_v13, %v961_v12  ;;  %v974_v26 = vunpack.c.h.bf16 %v991_v17  ;;  %v977_v29 = vunpack.c.l.bf16 %v992_v18  ;;  %v1290_v31 = vld [vmem:[%s1553_s1 + $0x28] sm:$0xff]   ;;  %v1291_v32 = vld [vmem:[%s1553_s1 + $0x30] sm:$0xff]   ;;  %v1292_v41 = vld [vmem:[%s1553_s1 + $0x38] sm:$0xff]   ;;  %s1415_s1 = smov [#allocation5]  }
  0x19   :  { %1048 = vmatmul.mubr.msk.bf16.vlgmr.msra.gmra.mrb[0].mxu0 %vm240_vm0, %v1286_v3  ;;  %1159 = vperm.xlu0 %1157, %v1475_v19   ;;  %v1485_v28 = vpack.i.bf16 %v970_v21, %v969_v20  ;;  %v978_v30 = vunpack.c.h.bf16 %v992_v18  ;;  %v981_v34 = vunpack.c.l.bf16 %v993_v23  ;;  %v982_v35 = vunpack.c.h.bf16 %v993_v23  ;;  %v1293_v42 = vld [vmem:[#allocation2] sm:$0xff]   ;;  %s912_s15 = sshll.u32 %s1415_s1, 4  ;;  %s913_s15 = int_to_ptr.vmem [resolvable:$true] %s912_s15 }
  0x1a   :  { %1051 = vmatprep.mubr.msk.bf16.mxu0 %vm240_vm0, %v1287_v4  ;;  %1170 = vperm.xlu1 %1168, %v1477_v22   ;;  %v1494_v33 = vpack.i.bf16 %v974_v26, %v973_v25  ;;  %v985_v37 = vunpack.c.l.bf16 %v994_v27  ;;  %v986_v38 = vunpack.c.h.bf16 %v994_v27  ;;  %s1380_s16 = scalar_lea.vmem %s913_s15, 128  ;;  %p1385_p9 = scmp.lt.s32.totalorder %s913_s15, %s913_s15 }
  0x1b   :  { %v1497_v36 = vpack.i.bf16 %v978_v30, %v977_v29  ;;  %v1501_v39 = vpack.i.bf16 %v982_v35, %v981_v34  ;;  %1079 = vmatprep.mubr.bf16.mxu1 %v1293_v42  ;;  %p1381_p8 = scmp.ne.s32.totalorder %s913_s15, %s1380_s16  ;;  %p1386_p10 = scmp.lt.s32.totalorder %s1380_s16, %s1380_s16 }
  0x1c   :  { %v1505_v40 = vpack.i.bf16 %v986_v38, %v985_v37 }
  0x1d   :  { %1164 = vperm.xlu0 %1157, %v1481_v24   ;;  %p1387_p11 = por %p1386_p10, %p1385_p9 }
  0x1e   :  { %1175 = vperm.xlu1 %1168, %v1485_v28  }
  0x1f   :  { %p1388_p12 = pnand %p1387_p11, %p1381_p8 }
  0x21   :  { %1052 = vmatmul.mubr.msk.bf16.gmra.mrb[4].mxu0 %vm240_vm0, %v1288_v8  ;;  %1180 = vperm.xlu0 %1157, %v1494_v33  }
  0x22   :  { %1055 = vmatprep.mubr.msk.bf16.mxu0 %vm240_vm0, %v1289_v9  ;;  %1185 = vperm.xlu1 %1168, %v1497_v36  }
  0x25   :  { %1190 = vperm.xlu0 %1157, %v1501_v39  }
  0x26   :  { %1195 = vperm.xlu1 %1168, %v1505_v40  }
  0x29   :  { %1056 = vmatmul.mubr.msk.bf16.gmra.mrb[8].mxu0 %vm240_vm0, %v1290_v31  ;;  %1199 = vset.pattern.permute.xlu0 %v1410_v43 }
  0x2a   :  { %1059 = vmatprep.mubr.msk.bf16.mxu0 %vm240_vm0, %v1291_v32  ;;  %1205 = vset.pattern.permute.xlu1 %v1410_v43 }
  0x2b   :  { %1201 = vperm.xlu0 %1199, %v1475_v19   ;;  %1207 = vperm.xlu1 %1205, %v1481_v24  }
  0x2f   :  { %1217 = vperm.xlu0 %1199, %v1485_v28   ;;  %1212 = vperm.xlu1 %1205, %v1477_v22  }
  0x31   :  { %1060 = vmatmul.mubr.msk.bf16.gmra.mrb[12].mxu0 %vm240_vm0, %v1292_v41 }
  0x33   :  { %1227 = vperm.xlu0 %1199, %v1497_v36   ;;  %1222 = vperm.xlu1 %1205, %v1494_v33  }
  0x37   :  { %1237 = vperm.xlu0 %1199, %v1505_v40   ;;  %1232 = vperm.xlu1 %1205, %v1501_v39  }
  0x98   :  { %v1160_v44 = vpop.permute.xlu0 %1159 }
  0x99   :  { %v1171_v46 = vpop.permute.xlu1 %1170 }
  0x9c   :  { %v1165_v45 = vpop.permute.xlu0 %1164 }
  0x9d   :  { %v1176_v54 = vpop.permute.xlu1 %1175 }
  0xa0   :  { %v1181_v13 = vpop.permute.xlu0 %1180 }
  0xa1   :  { %v1186_v9 = vpop.permute.xlu1 %1185 }
  0xa4   :  { %v1191_v29 = vpop.permute.xlu0 %1190 }
  0xa5   :  { %v1196_v26 = vpop.permute.xlu1 %1195 }
  0xec   :  { %v1049_v47 = vpop.f32.mrb[0].mxu0 }
  0xed   :  { %v1310_v48 = vadd.low.f32.bf16 %v1049_v47, %v1165_v45  ;;  %v299_v49 = vpop.f32.mrb[1].mxu0 }
  0xee   :  { %v1311_v50 = vadd.low.f32.bf16 %v299_v49, %v1160_v44  ;;  %v1050_v51 = vpop.f32.mrb[2].mxu0 }
  0xef   :  { %v1312_v52 = vadd.high.f32.bf16 %v1050_v51, %v1165_v45  ;;  %v302_v53 = vpop.f32.mrb[3].mxu0  ;;  %v364_v56 = vmax.f32 %v1310_v48, 0.0 }
  0xf0   :  { %v1313_v55 = vadd.high.f32.bf16 %v302_v53, %v1160_v44  ;;  %v362_v58 = vmax.f32 %v1311_v50, 0.0 }
  0xf1   :  { %v365_v57 = vmax.f32 %v1312_v52, 0.0 }
  0xf2   :  { %v363_v59 = vmax.f32 %v1313_v55, 0.0  ;;  %v1295_v55 = vld [vmem:[#allocation2 + $0x10] sm:$0xff]  }
  0xf3   :  { %v379_v60 = vpack.c.bf16 %v365_v57, %v364_v56  ;;  %v1296_v56 = vld [vmem:[#allocation2 + $0x18] sm:$0xff]   ;;  %v1297_v57 = vld [vmem:[#allocation2 + $0x20] sm:$0xff]  }
  0xf4   :  { %v1053_v61 = vpop.f32.mrb[4].mxu0  ;;  %v378_v62 = vpack.c.bf16 %v363_v59, %v362_v58  ;;  %v1298_v58 = vld [vmem:[#allocation2 + $0x28] sm:$0xff]   ;;  %v1299_v59 = vld [vmem:[#allocation2 + $0x30] sm:$0xff]  }
  0xf5   :  { %v1314_v63 = vadd.low.f32.bf16 %v1053_v61, %v1176_v54  ;;  %v315_v0 = vpop.f32.mrb[5].mxu0  ;;  %v1301_v61 = vld [vmem:[#allocation2 + $0x40] sm:$0xff]  }
  0xf6   :  { %v1315_v1 = vadd.low.f32.bf16 %v315_v0, %v1171_v46  ;;  %v1054_v2 = vpop.f32.mrb[6].mxu0  ;;  %1063 = vmatprep.subr.bf16.mxu1 %v378_v62  ;;  %1111 = vmatprep.mubr.bf16.mxu0 %v1301_v61  ;;  %v1202_v0 = vpop.permute.xlu0 %1201 }
  0xf7   :  { %v1316_v3 = vadd.high.f32.bf16 %v1054_v2, %v1176_v54  ;;  %v318_v4 = vpop.f32.mrb[7].mxu0  ;;  %1064 = vmatpush3.bf16.msra.mxu1 %v378_v62  ;;  %v368_v7 = vmax.f32 %v1314_v63, 0.0  ;;  %v1294_v54 = vld [vmem:[#allocation2 + $0x8] sm:$0xff]   ;;  %v1411_v62 = vmov 2   ;;  %v1208_v63 = vpop.permute.xlu1 %1207 }
  0xf8   :  { %v1317_v6 = vadd.high.f32.bf16 %v318_v4, %v1171_v46  ;;  %1065 = vmatprep.subr.bf16.mxu1 %v379_v60  ;;  %v366_v11 = vmax.f32 %v1315_v1, 0.0  ;;  %1241 = vset.pattern.permute.xlu1 %v1411_v62 }
  0xf9   :  { %v369_v8 = vmax.f32 %v1316_v3, 0.0  ;;  %1247 = vset.pattern.permute.xlu0 %v1411_v62  ;;  %1243 = vperm.xlu1 %1241, %v1475_v19  }
  0xfa   :  { %v367_v12 = vmax.f32 %v1317_v6, 0.0  ;;  %1249 = vperm.xlu0 %1247, %v1481_v24  }
  0xfb   :  { %v381_v14 = vpack.c.bf16 %v369_v8, %v368_v7  ;;  %1066 = vmatpush3.bf16.msra.mxu1 %v379_v60  ;;  %v1300_v60 = vld [vmem:[#allocation2 + $0x38] sm:$0xff]   ;;  %v1218_v8 = vpop.permute.xlu0 %1217 }
  0xfc   :  { %v380_v15 = vpack.c.bf16 %v367_v12, %v366_v11  ;;  %v1057_v16 = vpop.f32.mrb[8].mxu0 }
  0xfd   :  { %v1318_v17 = vadd.low.f32.bf16 %v1057_v16, %v1186_v9  ;;  %v331_v18 = vpop.f32.mrb[9].mxu0  ;;  %1254 = vperm.xlu1 %1241, %v1477_v22  }
  0xfe   :  { %v1319_v20 = vadd.low.f32.bf16 %v331_v18, %v1181_v13  ;;  %v1058_v21 = vpop.f32.mrb[10].mxu0  ;;  %1067 = vmatprep.subr.bf16.mxu1 %v380_v15  ;;  %1264 = vperm.xlu0 %1247, %v1494_v33  }
  0xff   :  { %v1320_v23 = vadd.high.f32.bf16 %v1058_v21, %v1186_v9  ;;  %v334_v25 = vpop.f32.mrb[11].mxu0  ;;  %1068 = vmatpush3.bf16.msra.mxu1 %v380_v15  ;;  %v372_v30 = vmax.f32 %v1318_v17, 0.0 }
 0x100   :  { %v1321_v27 = vadd.high.f32.bf16 %v334_v25, %v1181_v13  ;;  %1069 = vmatprep.subr.bf16.mxu1 %v381_v14  ;;  %v370_v32 = vmax.f32 %v1319_v20, 0.0 }
 0x101   :  { %v373_v31 = vmax.f32 %v1320_v23, 0.0  ;;  %1259 = vperm.xlu1 %1241, %v1485_v28   ;;  %v1228_v23 = vpop.permute.xlu0 %1227 }
 0x102   :  { %v371_v34 = vmax.f32 %v1321_v27, 0.0  ;;  %1274 = vperm.xlu0 %1247, %v1501_v39   ;;  %v1213_v39 = vpop.permute.xlu1 %1212 }
 0x103   :  { %v383_v35 = vpack.c.bf16 %v373_v31, %v372_v30  ;;  %1070 = vmatpush3.bf16.msra.mxu1 %v381_v14 }
 0x104   :  { %v382_v37 = vpack.c.bf16 %v371_v34, %v370_v32  ;;  %v1061_v38 = vpop.f32.mrb[12].mxu0 }
 0x105   :  { %v1322_v41 = vadd.low.f32.bf16 %v1061_v38, %v1196_v26  ;;  %v347_v42 = vpop.f32.mrb[13].mxu0  ;;  %1269 = vperm.xlu1 %1241, %v1497_v36  }
 0x106   :  { %v1323_v43 = vadd.low.f32.bf16 %v347_v42, %v1191_v29  ;;  %v1062_v44 = vpop.f32.mrb[14].mxu0  ;;  %1071 = vmatprep.subr.bf16.mxu1 %v382_v37  ;;  %v1223_v27 = vpop.permute.xlu1 %1222 }
 0x107   :  { %v1324_v45 = vadd.high.f32.bf16 %v1062_v44, %v1196_v26  ;;  %v350_v46 = vpop.f32.mrb[15].mxu0  ;;  %1072 = vmatpush3.bf16.msra.mxu1 %v382_v37  ;;  %v376_v48 = vmax.f32 %v1322_v41, 0.0  ;;  %v1238_v42 = vpop.permute.xlu0 %1237 }
 0x108   :  { %v1325_v47 = vadd.high.f32.bf16 %v350_v46, %v1191_v29  ;;  %1073 = vmatprep.subr.bf16.mxu1 %v383_v35  ;;  %v374_v50 = vmax.f32 %v1323_v43, 0.0 }
 0x109   :  { %v377_v49 = vmax.f32 %v1324_v45, 0.0  ;;  %1279 = vperm.xlu1 %1241, %v1505_v40  }
 0x10a   :  { %v375_v51 = vmax.f32 %v1325_v47, 0.0  ;;  %v1233_v44 = vpop.permute.xlu1 %1232 }
 0x10b   :  { %v385_v52 = vpack.c.bf16 %v377_v49, %v376_v48  ;;  %1074 = vmatpush3.bf16.msra.mxu1 %v383_v35 }
 0x10c   :  { %v384_v53 = vpack.c.bf16 %v375_v51, %v374_v50 }
 0x10e   :  { %1075 = vmatprep.subr.bf16.mxu1 %v384_v53 }
 0x10f   :  { %1076 = vmatpush3.bf16.msra.mxu1 %v384_v53 }
 0x110   :  { %1077 = vmatprep.subr.bf16.mxu1 %v385_v52 }
 0x113   :  { %1078 = vmatpush3.bf16.msra.mxu1 %v385_v52 }
 0x116   :  { %1080 = vmatmul.mubr.bf16.vlgmr.msra.gmra.mrb[0].mxu1 %v1294_v54 }
 0x117   :  { %1083 = vmatprep.mubr.bf16.mxu1 %v1295_v55 }
 0x11e   :  { %1084 = vmatmul.mubr.bf16.gmra.mrb[4].mxu1 %v1296_v56 }
 0x11f   :  { %1087 = vmatprep.mubr.bf16.mxu1 %v1297_v57 }
 0x126   :  { %1088 = vmatmul.mubr.bf16.gmra.mrb[8].mxu1 %v1298_v58 }
 0x127   :  { %1091 = vmatprep.mubr.bf16.mxu1 %v1299_v59 }
 0x12e   :  { %1092 = vmatmul.mubr.bf16.gmra.mrb[12].mxu1 %v1300_v60 }
 0x1e9   :  { %v1081_v1 = vpop.f32.mrb[0].mxu1 }
 0x1ea   :  { %v1326_v2 = vadd.low.f32.bf16 %v1081_v1, %v1208_v63  ;;  %v532_v3 = vpop.f32.mrb[1].mxu1  ;;  %v1302_v1 = vld [vmem:[#allocation2 + $0x48] sm:$0xff]  }
 0x1eb   :  { %v1327_v19 = vadd.low.f32.bf16 %v532_v3, %v1202_v0  ;;  %v1082_v4 = vpop.f32.mrb[2].mxu1  ;;  %v1304_v3 = vld [vmem:[#allocation2 + $0x58] sm:$0xff]  }
 0x1ec   :  { %v1328_v24 = vadd.high.f32.bf16 %v1082_v4, %v1208_v63  ;;  %v535_v6 = vpop.f32.mrb[3].mxu1  ;;  %v597_v7 = vmax.f32 %v1326_v2, 0.0  ;;  %v1303_v2 = vld [vmem:[#allocation2 + $0x50] sm:$0xff]   ;;  %v1306_v4 = vld [vmem:[#allocation2 + $0x68] sm:$0xff]  }
 0x1ed   :  { %v1329_v22 = vadd.high.f32.bf16 %v535_v6, %v1202_v0  ;;  %v595_v28 = vmax.f32 %v1327_v19, 0.0  ;;  %v1305_v19 = vld [vmem:[#allocation2 + $0x60] sm:$0xff]   ;;  %v1308_v6 = vld [vmem:[#allocation2 + $0x78] sm:$0xff]  }
 0x1ee   :  { %v598_v33 = vmax.f32 %v1328_v24, 0.0  ;;  %v1307_v24 = vld [vmem:[#allocation2 + $0x70] sm:$0xff]  }
 0x1ef   :  { %v596_v9 = vmax.f32 %v1329_v22, 0.0  ;;  %v1412_v22 = vmov 0.0  }
 0x1f0   :  { %v612_v11 = vpack.c.bf16 %v598_v33, %v597_v7  ;;  %1127 = vmatprep.subr.bf16.mxu1 %v1412_v22  ;;  %1143 = vmatprep.mubr.msk.bf16.mxu1 %vm1413_vm1, %v1412_v22  ;;  %v1414_v7 = vmov 3   ;;  %v1244_v33 = vpop.permute.xlu1 %1243 }
 0x1f1   :  { %v611_v36 = vpack.c.bf16 %v596_v9, %v595_v28  ;;  %v1085_v12 = vpop.f32.mrb[4].mxu1  ;;  %1283 = vset.pattern.permute.xlu0 %v1414_v7 }
 0x1f2   :  { %v1330_v40 = vadd.low.f32.bf16 %v1085_v12, %v1218_v8  ;;  %v548_v13 = vpop.f32.mrb[5].mxu1  ;;  %853 = vperm.xlu0 %1283, %v957_v10  }
 0x1f3   :  { %v1331_v14 = vadd.low.f32.bf16 %v548_v13, %v1213_v39  ;;  %v1086_v15 = vpop.f32.mrb[6].mxu1  ;;  %1095 = vmatprep.subr.bf16.mxu0 %v611_v36 }
 0x1f4   :  { %v1332_v16 = vadd.high.f32.bf16 %v1086_v15, %v1218_v8  ;;  %v551_v17 = vpop.f32.mrb[7].mxu1  ;;  %1096 = vmatpush3.bf16.msra.mxu0 %v611_v36  ;;  %v601_v20 = vmax.f32 %v1330_v40, 0.0  ;;  %v1250_v8 = vpop.permute.xlu0 %1249 }
 0x1f5   :  { %v1333_v18 = vadd.high.f32.bf16 %v551_v17, %v1213_v39  ;;  %1097 = vmatprep.subr.bf16.mxu0 %v612_v11  ;;  %v599_v25 = vmax.f32 %v1331_v14, 0.0  ;;  %v1255_v28 = vpop.permute.xlu1 %1254 }
 0x1f6   :  { %v602_v21 = vmax.f32 %v1332_v16, 0.0 }
 0x1f7   :  { %v600_v26 = vmax.f32 %v1333_v18, 0.0 }
 0x1f8   :  { %v614_v29 = vpack.c.bf16 %v602_v21, %v601_v20  ;;  %1098 = vmatpush3.bf16.msra.mxu0 %v612_v11 }
 0x1f9   :  { %v613_v30 = vpack.c.bf16 %v600_v26, %v599_v25  ;;  %v1089_v31 = vpop.f32.mrb[8].mxu1  ;;  %v1260_v17 = vpop.permute.xlu1 %1259 }
 0x1fa   :  { %v1334_v32 = vadd.low.f32.bf16 %v1089_v31, %v1228_v23  ;;  %v564_v34 = vpop.f32.mrb[9].mxu1 }
 0x1fb   :  { %v1335_v35 = vadd.low.f32.bf16 %v564_v34, %v1223_v27  ;;  %v1090_v37 = vpop.f32.mrb[10].mxu1  ;;  %1099 = vmatprep.subr.bf16.mxu0 %v613_v30 }
 0x1fc   :  { %v1336_v38 = vadd.high.f32.bf16 %v1090_v37, %v1228_v23  ;;  %v567_v41 = vpop.f32.mrb[11].mxu1  ;;  %1100 = vmatpush3.bf16.msra.mxu0 %v613_v30  ;;  %v605_v45 = vmax.f32 %v1334_v32, 0.0 }
 0x1fd   :  { %v1337_v43 = vadd.high.f32.bf16 %v567_v41, %v1223_v27  ;;  %1101 = vmatprep.subr.bf16.mxu0 %v614_v29  ;;  %v603_v47 = vmax.f32 %v1335_v35, 0.0  ;;  %v1270_v35 = vpop.permute.xlu1 %1269  ;;  %v1265_v41 = vpop.permute.xlu0 %1264 }
 0x1fe   :  { %v606_v46 = vmax.f32 %v1336_v38, 0.0 }
 0x1ff   :  { %v604_v48 = vmax.f32 %v1337_v43, 0.0 }
 0x200   :  { %v616_v49 = vpack.c.bf16 %v606_v46, %v605_v45  ;;  %1102 = vmatpush3.bf16.msra.mxu0 %v614_v29 }
 0x201   :  { %v615_v50 = vpack.c.bf16 %v604_v48, %v603_v47  ;;  %v1093_v51 = vpop.f32.mrb[12].mxu1 }
 0x202   :  { %v1338_v52 = vadd.low.f32.bf16 %v1093_v51, %v1238_v42  ;;  %v580_v53 = vpop.f32.mrb[13].mxu1  ;;  %v1280_v51 = vpop.permute.xlu1 %1279 }
 0x203   :  { %v1339_v54 = vadd.low.f32.bf16 %v580_v53, %v1233_v44  ;;  %v1094_v55 = vpop.f32.mrb[14].mxu1  ;;  %1103 = vmatprep.subr.bf16.mxu0 %v615_v50  ;;  %v1275_v53 = vpop.permute.xlu0 %1274 }
 0x204   :  { %v1340_v56 = vadd.high.f32.bf16 %v1094_v55, %v1238_v42  ;;  %v583_v57 = vpop.f32.mrb[15].mxu1  ;;  %1104 = vmatpush3.bf16.msra.mxu0 %v615_v50  ;;  %v609_v59 = vmax.f32 %v1338_v52, 0.0 }
 0x205   :  { %v1341_v58 = vadd.high.f32.bf16 %v583_v57, %v1233_v44  ;;  %1105 = vmatprep.subr.bf16.mxu0 %v616_v49  ;;  %v607_v61 = vmax.f32 %v1339_v54, 0.0 }
 0x206   :  { %v610_v60 = vmax.f32 %v1340_v56, 0.0 }
 0x207   :  { %v608_v62 = vmax.f32 %v1341_v58, 0.0 }
 0x208   :  { %v618_v63 = vpack.c.bf16 %v610_v60, %v609_v59  ;;  %1106 = vmatpush3.bf16.msra.mxu0 %v616_v49 }
 0x209   :  { %v617_v0 = vpack.c.bf16 %v608_v62, %v607_v61 }
 0x20b   :  { %1107 = vmatprep.subr.bf16.mxu0 %v617_v0 }
 0x20c   :  { %1108 = vmatpush3.bf16.msra.mxu0 %v617_v0 }
 0x20d   :  { %1109 = vmatprep.subr.bf16.mxu0 %v618_v63 }
 0x210   :  { %1110 = vmatpush3.bf16.msra.mxu0 %v618_v63 }
 0x213   :  { %1112 = vmatmul.mubr.bf16.vlgmr.msra.gmra.mrb[16].mxu0 %v1302_v1 }
 0x214   :  { %1115 = vmatprep.mubr.bf16.mxu0 %v1303_v2 }
 0x21b   :  { %1116 = vmatmul.mubr.bf16.gmra.mrb[20].mxu0 %v1304_v3 }
 0x21c   :  { %1119 = vmatprep.mubr.bf16.mxu0 %v1305_v19 }
 0x223   :  { %1120 = vmatmul.mubr.bf16.gmra.mrb[24].mxu0 %v1306_v4 }
 0x224   :  { %1123 = vmatprep.mubr.bf16.mxu0 %v1307_v24 }
 0x22b   :  { %1124 = vmatmul.mubr.bf16.gmra.mrb[28].mxu0 %v1308_v6 }
 0x2e6   :  { %v1113_v9 = vpop.f32.mrb[16].mxu0 }
 0x2e7   :  { %v1342_v39 = vadd.low.f32.bf16 %v1113_v9, %v1250_v8  ;;  %v765_v11 = vpop.f32.mrb[17].mxu0 }
 0x2e8   :  { %v1343_v36 = vadd.low.f32.bf16 %v765_v11, %v1244_v33  ;;  %v1114_v12 = vpop.f32.mrb[18].mxu0 }
 0x2e9   :  { %v1344_v40 = vadd.high.f32.bf16 %v1114_v12, %v1250_v8  ;;  %v768_v13 = vpop.f32.mrb[19].mxu0  ;;  %v830_v15 = vmax.f32 %v1342_v39, 0.0  ;;  %v1309_v8 = vld [vmem:[#allocation2 + $0x80] sm:$0xff]  }
 0x2ea   :  { %v1345_v14 = vadd.high.f32.bf16 %v768_v13, %v1244_v33  ;;  %v828_v18 = vmax.f32 %v1343_v36, 0.0 }
 0x2eb   :  { %v831_v16 = vmax.f32 %v1344_v40, 0.0 }
 0x2ec   :  { %v829_v20 = vmax.f32 %v1345_v14, 0.0 }
 0x2ed   :  { %v845_v21 = vpack.c.bf16 %v831_v16, %v830_v15 }
 0x2ee   :  { %v844_v23 = vpack.c.bf16 %v829_v20, %v828_v18  ;;  %v1117_v5 = vpop.f32.mrb[20].mxu0 }
 0x2ef   :  { %v1346_v10 = vadd.low.f32.bf16 %v1117_v5, %v1260_v17  ;;  %v781_v25 = vpop.f32.mrb[21].mxu0 }
 0x2f0   :  { %v1347_v26 = vadd.low.f32.bf16 %v781_v25, %v1255_v28  ;;  %v1118_v27 = vpop.f32.mrb[22].mxu0  ;;  %1128 = vmatpush3.bf16.msra.mxu1 %v844_v23 }
 0x2f1   :  { %v1348_v29 = vadd.high.f32.bf16 %v1118_v27, %v1260_v17  ;;  %v784_v30 = vpop.f32.mrb[23].mxu0  ;;  %1129 = vmatprep.subr.bf16.mxu1 %v1412_v22  ;;  %v834_v32 = vmax.f32 %v1346_v10, 0.0 }
 0x2f2   :  { %v1349_v31 = vadd.high.f32.bf16 %v784_v30, %v1255_v28  ;;  %v832_v37 = vmax.f32 %v1347_v26, 0.0  ;;  %v854_v28 = vpop.permute.xlu0 %853 }
 0x2f3   :  { %v835_v34 = vmax.f32 %v1348_v29, 0.0 }
 0x2f4   :  { %v833_v38 = vmax.f32 %v1349_v31, 0.0  ;;  %1130 = vmatpush3.bf16.msra.mxu1 %v845_v21 }
 0x2f5   :  { %v847_v42 = vpack.c.bf16 %v835_v34, %v834_v32  ;;  %1131 = vmatprep.subr.bf16.mxu1 %v1412_v22 }
 0x2f6   :  { %v846_v43 = vpack.c.bf16 %v833_v38, %v832_v37  ;;  %v1121_v44 = vpop.f32.mrb[24].mxu0 }
 0x2f7   :  { %v1350_v45 = vadd.low.f32.bf16 %v1121_v44, %v1270_v35  ;;  %v797_v46 = vpop.f32.mrb[25].mxu0 }
 0x2f8   :  { %v1351_v47 = vadd.low.f32.bf16 %v797_v46, %v1265_v41  ;;  %v1122_v48 = vpop.f32.mrb[26].mxu0  ;;  %1132 = vmatpush3.bf16.msra.mxu1 %v846_v43 }
 0x2f9   :  { %v1352_v49 = vadd.high.f32.bf16 %v1122_v48, %v1270_v35  ;;  %v800_v50 = vpop.f32.mrb[27].mxu0  ;;  %1133 = vmatprep.subr.bf16.mxu1 %v1412_v22  ;;  %v838_v54 = vmax.f32 %v1350_v45, 0.0 }
 0x2fa   :  { %v1353_v52 = vadd.high.f32.bf16 %v800_v50, %v1265_v41  ;;  %v836_v56 = vmax.f32 %v1351_v47, 0.0 }
 0x2fb   :  { %v839_v55 = vmax.f32 %v1352_v49, 0.0 }
 0x2fc   :  { %v837_v57 = vmax.f32 %v1353_v52, 0.0  ;;  %1134 = vmatpush3.bf16.msra.mxu1 %v847_v42 }
 0x2fd   :  { %v849_v58 = vpack.c.bf16 %v839_v55, %v838_v54  ;;  %1135 = vmatprep.subr.bf16.mxu1 %v1412_v22 }
 0x2fe   :  { %v848_v59 = vpack.c.bf16 %v837_v57, %v836_v56  ;;  %v1125_v60 = vpop.f32.mrb[28].mxu0 }
 0x2ff   :  { %v1354_v61 = vadd.low.f32.bf16 %v1125_v60, %v1280_v51  ;;  %v813_v62 = vpop.f32.mrb[29].mxu0 }
 0x300   :  { %v1355_v63 = vadd.low.f32.bf16 %v813_v62, %v1275_v53  ;;  %v1126_v0 = vpop.f32.mrb[30].mxu0  ;;  %1136 = vmatpush3.bf16.msra.mxu1 %v848_v59 }
 0x301   :  { %v1356_v1 = vadd.high.f32.bf16 %v1126_v0, %v1280_v51  ;;  %v816_v2 = vpop.f32.mrb[31].mxu0  ;;  %1137 = vmatprep.subr.bf16.mxu1 %v1412_v22  ;;  %v842_v19 = vmax.f32 %v1354_v61, 0.0 }
 0x302   :  { %v1357_v3 = vadd.high.f32.bf16 %v816_v2, %v1275_v53  ;;  %v840_v24 = vmax.f32 %v1355_v63, 0.0 }
 0x303   :  { %v843_v4 = vmax.f32 %v1356_v1, 0.0 }
 0x304   :  { %v841_v6 = vmax.f32 %v1357_v3, 0.0  ;;  %1138 = vmatpush3.bf16.msra.mxu1 %v849_v58 }
 0x305   :  { %v851_v7 = vpack.c.bf16 %v843_v4, %v842_v19  ;;  %1139 = vmatprep.subr.bf16.mxu1 %v1412_v22 }
 0x306   :  { %v850_v33 = vpack.c.bf16 %v841_v6, %v840_v24 }
 0x308   :  { %1140 = vmatpush3.bf16.msra.mxu1 %v850_v33 }
 0x309   :  { %1141 = vmatprep.subr.bf16.mxu1 %v1412_v22 }
 0x30c   :  { %1142 = vmatpush3.bf16.msra.mxu1 %v851_v7 }
 0x30f   :  { %1144 = vmatmul.mubr.bf16.vlgmr.msra.gmra.mrb[16].mxu1 %v1309_v8 }
 0x3e2   :  { %v899_v9 = vpop.f32.mrb[16].mxu1 }
 0x3e3   :  { %v900_v39 = vadd.f32 %v899_v9, %v854_v28  ;;  %v1145_v11 = vpop.f32.mrb[17].mxu1 }
 0x3e4   :  { %v902_v36 = vpop.f32.mrb[18].mxu1 }
 0x3e5   :  { %905 = vst [vmem:[#allocation5] sm:$0xff] %v900_v39  ;;  %v1146_v12 = vpop.f32.mrb[19].mxu1 }
 0x3e6   :  { %1391 = shalt.err (!%p1388_p12)
}
 0x3e7   :  { %s1392_s19 = scalar_lea.hbm %s1555_s3, 128 }
 0x3e8   :  { %p1393_p13 = scmp.ne.s32.totalorder %s1555_s3, %s1392_s19  ;;  %p1396_p0 = scmp.lt.u32.totalorder %s1392_s19, %s1555_s3 }
 0x3ea   :  { %p1398_p1 = pnand %p1396_p0, %p1393_p13 }
 0x3ec   :  { %1401 = shalt.err (!%p1398_p1)
}
 0x3ed   :  { %915 = dma.vmem_to_hbm [thread:$0]  %s913_s15, 128, %s1555_s3, [#allocation4]  }
 0x3ee   :  { %1404 = dma.done.wait [#allocation4], 128  }
 0x3ef   :  { %1405 = vsyncadd [#allocation4], 4294967168 }
 0x3f0   :  { %919 = vsyncpa [#allocation3], 1 }
 0x3f1   :  { %920 = vsyncpa [#allocation4], 1 }

</bundles_post_ra>
